<compile_context>
chip_gen: v5e
topology: v5e:2x2
jax: 0.10.0
libtpu: 0.0.40
codegen_flags: <defaults>
</compile_context>

<pallas_src>
import jax
import jax.numpy as jnp
from jax.experimental import pallas as pl
from jax.experimental.pallas import tpu as pltpu


def _top1_max_tile_kernel(logit_ref, psum_ref):
    """One row tile (TM, B): writes the partial sum of softmax*(sig(diff)+sig(x^2))."""
    i = pl.program_id(0)
    tm = logit_ref.shape[0]  # static tile height

    x = logit_ref[...].astype(jnp.float32)                    # (TM, B)

    # Numerically stable softmax exponent (reused below for sigmoid(x - diag)).
    row_max = jnp.max(x, axis=1, keepdims=True)
    e = jnp.exp(x - row_max)                                   # (TM, B)

    # Diagonal of the *global* matrix: column index == global row index.
    rows = jax.lax.broadcasted_iota(jnp.int32, x.shape, 0)
    cols = jax.lax.broadcasted_iota(jnp.int32, x.shape, 1)
    diag_mask = cols == (rows + i * tm)
    e_diag = jnp.sum(jnp.where(diag_mask, e, 0.0), axis=1, keepdims=True)  # (TM, 1)

    # sigmoid(x - diag) == e / (e + e_diag): one approx EUP reciprocal instead
    # of an extra exp + exact reciprocal. The tiny epsilon only matters when
    # both exponents underflow to 0, in which case the softmax weight is 0 too.
    sig_diff = e * pl.reciprocal(e + e_diag + 1e-30, approx=True)
    sig_sq = jax.nn.sigmoid(x * x)

    # sum_j softmax_ij * (...)  ==  (sum_j e_ij * (...)) * (1 / sum_j e_ij)
    row_inner = jnp.sum(e * (sig_diff + sig_sq), axis=1, keepdims=True)    # (TM, 1)
    row_norm = pl.reciprocal(jnp.sum(e, axis=1, keepdims=True), approx=True)

    psum_ref[...] = jnp.sum(row_inner * row_norm).reshape(1, 1, 1)


def _choose_row_tile(b: int, itemsize: int) -> int:
    """Largest row tile that divides B and keeps a single buffer <= 8 MiB."""
    budget = 8 * 1024 * 1024
    for tm in (1024, 512, 256, 128, 64, 32, 16, 8):
        if b % tm == 0 and tm * b * itemsize <= budget:
            return tm
    return b  # small / odd B: fall back to a single full block


def top1_max_loss(logit: jax.Array, *, row_tile: int | None = None) -> jax.Array:
    """Pallas TPU implementation of TOP1_max.forward. `logit` must be (B, B)."""
    assert logit.ndim == 2 and logit.shape[0] == logit.shape[1], "logit must be square"
    b = logit.shape[0]
    tm = row_tile if row_tile is not None else _choose_row_tile(b, logit.dtype.itemsize)
    assert b % tm == 0, "row tile must divide B"
    n_tiles = b // tm

    partials = pl.pallas_call(
        _top1_max_tile_kernel,
        out_shape=jax.ShapeDtypeStruct((n_tiles, 1, 1), jnp.float32),
        grid_spec=pltpu.PrefetchScalarGridSpec(
            num_scalar_prefetch=0,
            grid=(n_tiles,),
            in_specs=[pl.BlockSpec((tm, b), lambda i: (i, 0))],
            out_specs=pl.BlockSpec((1, 1, 1), lambda i: (i, 0, 0)),
        ),
        compiler_params=pltpu.CompilerParams(
            dimension_semantics=("parallel",),
        ),
    )(logit)  # NOTE: no wrapper-side dtype cast; kernel up-casts in VMEM.

    # Tiny (n_tiles,) reduction left to XLA; divide by B*B for the global mean.
    return jnp.sum(partials) / jnp.float32(b * b)


def _reference(logit):
    # Pure-JAX reference mirroring the PyTorch forward.
    logit = logit.astype(jnp.float32)
    sm = jax.nn.softmax(logit, axis=1)
    diag = jnp.diag(logit)[:, None]
    diff = -(diag - logit)
    return jnp.mean(sm * (jax.nn.sigmoid(diff) + jax.nn.sigmoid(logit ** 2)))


if __name__ == "__main__":
    key = jax.random.PRNGKey(0)

    # Small single-tile case (B=8, matches the original test shape).
    b_small = 8
    logit_small = jax.random.normal(key, (b_small, b_small), dtype=jnp.float32)
    loss_small = top1_max_loss(logit_small)
    jax.block_until_ready(loss_small)
    ref_small = _reference(logit_small)
    assert jnp.allclose(loss_small, ref_small, rtol=5e-3, atol=1e-5), (loss_small, ref_small)

    # Multi-tile case: exercises the row-tiled grid and the global-diagonal
    # offset logic (4 tiles of 8 rows each).
    b_multi = 32
    key2 = jax.random.PRNGKey(0)
    logit_multi = jax.random.normal(key2, (b_multi, b_multi), dtype=jnp.float32)
    loss_multi = top1_max_loss(logit_multi, row_tile=8)
    jax.block_until_ready(loss_multi)
    ref_multi = _reference(logit_multi)
    assert jnp.allclose(loss_multi, ref_multi, rtol=5e-3, atol=1e-5), (loss_multi, ref_multi)

    print("KERNEL_OK")
</pallas_src>

<mosaic_0001>
module attributes {stable_mosaic.version = 11 : i64} {
  func.func @_top1_max_tile_kernel(%arg0: i32, %arg1: memref<8x8xf32, #tpu.memory_space<vmem>>, %arg2: memref<1x1x1xf32, #tpu.memory_space<vmem>>) attributes {dimension_semantics = [#tpu.dimension_semantics<parallel>], iteration_bounds = array<i64: 1>, scalar_prefetch = 0 : i64, scratch_operands = 0 : i64, tpu.core_type = #tpu.core_type<tc>, window_params = [{transform_indices = @transform_0, window_bounds = array<i64: 8, 8>}, {transform_indices = @transform_1, window_bounds = array<i64: 1, 1, 1>}]} {
    %c0 = arith.constant 0 : index
    %c0_0 = arith.constant 0 : index
    %0 = vector.load %arg1[%c0, %c0_0] : memref<8x8xf32, #tpu.memory_space<vmem>>, vector<8x8xf32>
    %cst = arith.constant dense<0xFF800000> : vector<8xf32>
    %1 = vector.multi_reduction <maximumf>, %0, %cst [1] : vector<8x8xf32> to vector<8xf32>
    %2 = vector.shape_cast %1 : vector<8xf32> to vector<8x1xf32>
    %3 = vector.broadcast %2 : vector<8x1xf32> to vector<8x8xf32>
    %4 = arith.subf %0, %3 : vector<8x8xf32>
    %5 = math.exp %4 : vector<8x8xf32>
    %6 = tpu.iota {dimensions = array<i32: 0>} : vector<8x8xi32>
    %7 = tpu.iota {dimensions = array<i32: 1>} : vector<8x8xi32>
    %c8_i32 = arith.constant 8 : i32
    %8 = arith.muli %arg0, %c8_i32 : i32
    %9 = vector.broadcast %8 : i32 to vector<8x8xi32>
    %10 = arith.addi %6, %9 : vector<8x8xi32>
    %11 = arith.cmpi eq, %7, %10 : vector<8x8xi32>
    %cst_1 = arith.constant 0.000000e+00 : f32
    %12 = vector.broadcast %cst_1 : f32 to vector<8x8xf32>
    %13 = arith.select %11, %5, %12 : vector<8x8xi1>, vector<8x8xf32>
    %cst_2 = arith.constant dense<0.000000e+00> : vector<8xf32>
    %14 = vector.multi_reduction <add>, %13, %cst_2 [1] : vector<8x8xf32> to vector<8xf32>
    %15 = vector.shape_cast %14 : vector<8xf32> to vector<8x1xf32>
    %16 = vector.broadcast %15 : vector<8x1xf32> to vector<8x8xf32>
    %17 = arith.addf %5, %16 : vector<8x8xf32>
    %cst_3 = arith.constant 1.000000e-30 : f32
    %18 = vector.broadcast %cst_3 : f32 to vector<8x8xf32>
    %19 = arith.addf %17, %18 : vector<8x8xf32>
    %20 = tpu.reciprocal %19 {approx = true} : vector<8x8xf32> -> vector<8x8xf32>
    %21 = arith.mulf %5, %20 : vector<8x8xf32>
    %22 = arith.mulf %0, %0 : vector<8x8xf32>
    %23 = arith.negf %22 : vector<8x8xf32>
    %24 = math.exp %23 : vector<8x8xf32>
    %cst_4 = arith.constant 1.000000e+00 : f32
    %25 = vector.broadcast %cst_4 : f32 to vector<8x8xf32>
    %26 = arith.addf %25, %24 : vector<8x8xf32>
    %27 = arith.divf %25, %26 : vector<8x8xf32>
    %28 = arith.addf %21, %27 : vector<8x8xf32>
    %29 = arith.mulf %5, %28 : vector<8x8xf32>
    %cst_5 = arith.constant dense<0.000000e+00> : vector<8xf32>
    %30 = vector.multi_reduction <add>, %29, %cst_5 [1] : vector<8x8xf32> to vector<8xf32>
    %31 = vector.shape_cast %30 : vector<8xf32> to vector<8x1xf32>
    %cst_6 = arith.constant dense<0.000000e+00> : vector<8xf32>
    %32 = vector.multi_reduction <add>, %5, %cst_6 [1] : vector<8x8xf32> to vector<8xf32>
    %33 = vector.shape_cast %32 : vector<8xf32> to vector<8x1xf32>
    %34 = tpu.reciprocal %33 {approx = true} : vector<8x1xf32> -> vector<8x1xf32>
    %35 = arith.mulf %31, %34 : vector<8x1xf32>
    %36 = vector.shape_cast %35 : vector<8x1xf32> to vector<1x8x1xf32>
    %cst_7 = arith.constant dense<0.000000e+00> : vector<1xf32>
    %37 = vector.multi_reduction <add>, %36, %cst_7 [1, 2] : vector<1x8x1xf32> to vector<1xf32>
    %38 = vector.shape_cast %37 : vector<1xf32> to vector<1x1x1xf32>
    %39 = vector.extract %38[0, 0, 0] : f32 from vector<1x1x1xf32>
    %40 = vector.broadcast %39 : f32 to vector<1x1x1xf32>
    %c0_8 = arith.constant 0 : index
    %c0_9 = arith.constant 0 : index
    %c0_10 = arith.constant 0 : index
    %41 = vector.load %arg2[%c0_8, %c0_9, %c0_10] : memref<1x1x1xf32, #tpu.memory_space<vmem>>, vector<1x1x1xf32>
    tpu.vector_store %arg2[%c0_8, %c0_9, %c0_10], %40 {strides = array<i32>} : memref<1x1x1xf32, #tpu.memory_space<vmem>>, vector<1x1x1xf32>,
    return
  }
  func.func @transform_0(%arg0: i32) -> (i32, i32) {
    %c0_i32 = arith.constant 0 : i32
    %c0_i32_0 = arith.constant 0 : i32
    return %arg0, %c0_i32 : i32, i32
  }
  func.func @transform_1(%arg0: i32) -> (i32, i32, i32) {
    %c0_i32 = arith.constant 0 : i32
    %c0_i32_0 = arith.constant 0 : i32
    %c0_i32_1 = arith.constant 0 : i32
    return %arg0, %c0_i32, %c0_i32_0 : i32, i32, i32
  }
}

</mosaic_0001>

<bundles_post_ra>
// kernel: tpu_custom_call.1
= control target key start
LH: loop header
LB: loop body
LE: loop exit
PB: predicated region body
PF: predicated region fallthrough
CT: control target
= control target key end

     0   :  { %6 = vsyncpa [#allocation3], 0  ;;  %s197_s0 = inlined_call_operand.hbm [shape: f32[8,8], index: 0, kind: input, shape index: {}]   ;;  %s198_s1 = inlined_call_operand.hbm [shape: f32[1,1,1], index: 1, kind: output, shape index: {}]  }
   0x1   :  { %7 = vsyncpa [#allocation4], 0  ;;  %s13_s8 = sshll.u32 %s197_s0, 4  ;;  %s175_s9 = smov [#allocation2]   ;;  %s14_s8 = int_to_ptr.hbm [resolvable:$true] %s13_s8 }
   0x2   :  { %s15_s10 = sshll.u32 %s175_s9, 4  ;;  %s16_s10 = int_to_ptr.vmem [resolvable:$true] %s15_s10 }
   0x3   :  { %18 = dma.hbm_to_vmem [thread:$0]  %s14_s8, 128, %s16_s10, [#allocation3]  }
   0x4   :  { %171 = dma.done.wait [#allocation3], 128  }
   0x5   :  { %172 = vsyncadd [#allocation3], 4294967168  ;;  %vm24_vm0 = vcmask 64512   ;;  %v23_v0 = vld [vmem:[#allocation2] sm:$0xff]  ;;  %v31_v4 = vlaneseq  ;;  %vm77_vm6 = vcmask 7168   ;;  %s176_s0 = smov [#allocation5]  }
   0x6   :  { %v25_v1 = vsel %vm24_vm0, %v23_v0, -inf  ;;  %v47_v12 = vmul.f32 %v23_v0, %v23_v0  ;;  %s96_s11 = sshll.u32 %s176_s0, 4  ;;  %s98_s14 = sshll.u32 %s198_s1, 4  ;;  %vm89_vm7 = vcmask 0   ;;  %s97_s11 = int_to_ptr.vmem [resolvable:$true] %s96_s11  ;;  %s99_s14 = int_to_ptr.hbm [resolvable:$true] %s98_s14 }
   0x7   :  { %26 = vmax.xlane.f32.xlu0 %v25_v1  ;;  %v32_v6 = vshrl.u32 %v31_v4, 7  ;;  %v34_v7 = vand.u32 127, %v31_v4 }
   0x8   :  { %v108_v13 = vmul.f32 -1.442695, %v47_v12 }
   0x9   :  { %vm38_vm1 = vcmp.eq.s32.totalorder %v34_v7, %v32_v6 }
  0x7a   :  { %v27_v2 = vpop.xlane.xlu0 %26 }
  0x7b   :  { %v28_v3 = vsub.f32 %v23_v0, %v27_v2 }
  0x7d   :  { %v29_v5 = vmul.f32 1.442695, %v28_v3 }
  0x7f   :  { %113 = vpow2.f32 %v29_v5 }
  0x80   :  { %115 = vpow2.f32 %v108_v13 }
  0x85   :  { %v114_v8 = vpop.eup %113 }
  0x86   :  { %v72_v9 = vsel %vm24_vm0, %v114_v8, 0.0  ;;  %v39_v10 = vsel %vm38_vm1, %v114_v8, 0.0  ;;  %v116_v14 = vpop.eup %115 }
  0x87   :  { %73 = vadd.xlane.f32.xlu1 %v72_v9  ;;  %v40_v11 = vsel %vm24_vm0, %v39_v10, 0.0  ;;  %v51_v15 = vadd.f32 1.0, %v116_v14 }
  0x88   :  { %41 = vadd.xlane.f32.xlu0 %v40_v11 }
  0x89   :  { %117 = vrcp.f32 %v51_v15  ;;  %vm57_vm2 = vweird.f32 %v51_v15  ;;  %v63_v23 = vand.u32 2147483648, %v51_v15  ;;  %v61_v25 = vand.u32 2147483647, %v51_v15 }
  0x8b   :  { %v64_v26 = vor.u32 1.1754944e-38, %v63_v23  ;;  %vm62_vm5 = vcmp.eq.f32.partialorder %v61_v25, 8.507059e+37 }
  0x8f   :  { %v118_v16 = vpop.eup %117 }
  0x90   :  { %v53_v17 = vmul.f32 %v118_v16, %v51_v15  ;;  %vm58_vm3 = vweird.f32 %v118_v16 }
  0x91   :  { %vm59_vm4 = vmor %vm57_vm2, %vm58_vm3 }
  0x92   :  { %v54_v18 = vsub.f32 1.0, %v53_v17 }
  0x94   :  { %v55_v20 = vmul.f32 %v118_v16, %v54_v18 }
  0x96   :  { %v56_v24 = vadd.f32 %v118_v16, %v55_v20 }
  0x98   :  { %v60_v27 = vsel %vm59_vm4, %v118_v16, %v56_v24 }
  0x99   :  { %v65_v29 = vsel %vm62_vm5, %v64_v26, %v60_v27 }
  0xfa   :  { %v74_v34 = vpop.xlane.xlu1 %73 }
  0xfb   :  { %v42_v19 = vpop.xlane.xlu0 %41 }
  0xfc   :  { %v43_v21 = vadd.f32 %v114_v8, %v42_v19 }
  0xfe   :  { %v44_v22 = vadd.f32 1e-30, %v43_v21 }
 0x100   :  { %119 = vrcp.f32 %v44_v22 }
 0x101   :  { %121 = vrcp.f32 %v74_v34 }
 0x106   :  { %v120_v28 = vpop.eup %119 }
 0x107   :  { %v46_v30 = vmul.f32 %v120_v28, %v114_v8  ;;  %v122_v35 = vpop.eup %121 }
 0x109   :  { %v67_v31 = vadd.f32 %v65_v29, %v46_v30 }
 0x10b   :  { %v68_v32 = vmul.f32 %v114_v8, %v67_v31 }
 0x10d   :  { %v69_v33 = vsel %vm24_vm0, %v68_v32, 0.0 }
 0x10e   :  { %70 = vadd.xlane.f32.xlu1 %v69_v33 }
 0x181   :  { %v71_v36 = vpop.xlane.xlu1 %70 }
 0x182   :  { %v76_v37 = vmul.f32 %v122_v35, %v71_v36 }
 0x184   :  { %v78_v38 = vsel %vm77_vm6, %v76_v37, 0.0 }
 0x185   :  { %79 = vadd.xlane.f32.xlu2 %v78_v38 }
 0x1f8   :  { %v80_v39 = vpop.xlane.xlu2 %79 }
 0x1f9   :  { %v81_v40 = vrot.slane %v80_v39, 4 }
 0x1fb   :  { %v82_v41 = vadd.f32 %v81_v40, %v80_v39 }
 0x1fd   :  { %v83_v42 = vrot.slane %v82_v41, 2 }
 0x1ff   :  { %v84_v43 = vadd.f32 %v83_v42, %v82_v41 }
 0x201   :  { %v85_v44 = vrot.slane %v84_v43, 1 }
 0x203   :  { %v86_v45 = vadd.f32 %v85_v44, %v84_v43 }
 0x205   :  { %109 = vpush %v86_v45 }
 0x236   :  { %s110_s15 = spop %109 }
 0x237   :  { %v88_v46 = vstv %s110_s15 }
 0x238   :  { %90 = vst.msk [vmem:[#allocation5] sm:$0x1] %vm89_vm7, %v88_v46 }
 0x239   :  { %101 = dma.vmem_to_hbm [thread:$0]  %s97_s11, 16, %s99_s14, [#allocation4]  }
 0x23a   :  { %173 = dma.done.wait [#allocation4], 16  }
 0x23b   :  { %174 = vsyncadd [#allocation4], 4294967280 }
 0x23c   :  { %106 = vsyncpa [#allocation3], 1 }
 0x23d   :  { %107 = vsyncpa [#allocation4], 1 }

</bundles_post_ra>
